<compile_context>
chip_gen: v7x
topology: tpu7x:2x2x1
jax: 0.10.0
libtpu: 0.0.40
codegen_flags: <defaults>
</compile_context>

<pallas_src>
import jax
import jax.numpy as jnp
from jax.experimental import pallas as pl
from jax.experimental.pallas import tpu as pltpu

# ---------------- model config (matches the PyTorch module) -----------------
TASK_EMBEDDING_SIZE = 8          # unused in forward, kept for fidelity
AUG_STATE_SIZE = 16              # augmented_encode_state_size
ACTION_SIZE = 4
STATE_EMBED_SIZE = 32
ACTION_EMBED_SIZE = 16
LAYERS = (64, 32)
OUT_SIZE = 50                    # gaussian heads
MAX_SIGMA = 10.0
MIN_SIGMA = 0.0001
LN_EPS = 1e-5                    # torch nn.LayerNorm default

IN_SIZE = AUG_STATE_SIZE + ACTION_SIZE               # 20 (fused encoder rows)
ENC_SIZE = STATE_EMBED_SIZE + ACTION_EMBED_SIZE      # 48 (concat(hs, ha))
H1, H2 = LAYERS                                      # 64, 32
HEAD_PAD = 128                                       # lane-dense fused head width
SIGMA_COL = 64                                       # sigma lanes start here

BATCH = 16


def _align(n, m):
    return -(-n // m) * m


# Row layout of the packed bf16 WEIGHT buffer [W_ROWS, 128].
# Offsets are multiples of 16 (bf16 sublane tile) so every slice is clean.
ROW_WENC = 0                                   # [IN_SIZE, ENC_SIZE] block-diag encoder
ROW_W1 = ROW_WENC + _align(IN_SIZE, 16)        # 32:  [ENC_SIZE, H1]
ROW_W2 = ROW_W1 + _align(ENC_SIZE, 16)         # 80:  [H1, H2]
ROW_WHD = ROW_W2 + _align(H1, 16)              # 144: [H2, HEAD_PAD] fused mu|sigma head
W_ROWS = ROW_WHD + _align(H2, 16)              # 176

# Row layout of the packed f32 VECTOR buffer [V_ROWS, 128] (biases / LN).
ROW_BENC, ROW_B1, ROW_B2, ROW_LNW, ROW_LNB, ROW_BHD = range(6)
V_ROWS = _align(6, 8)                          # 8


# ------------------------------ kernel --------------------------------------
def _decoder_kernel(s_ref, a_ref, w_ref, v_ref, out_ref):
    # activations cast to bf16 only at the MXU inputs; accumulation is f32
    s = s_ref[...].astype(jnp.bfloat16)                  # [B, 16]
    a = a_ref[...].astype(jnp.bfloat16)                  # [B, 4]
    W = w_ref                                            # [W_ROWS, 128] bf16
    V = v_ref                                            # [V_ROWS, 128] f32

    # static slices of the packed parameter buffers (zero runtime cost)
    w_s = W[ROW_WENC:ROW_WENC + AUG_STATE_SIZE, 0:ENC_SIZE]            # [16, 48]
    w_a = W[ROW_WENC + AUG_STATE_SIZE:ROW_WENC + IN_SIZE, 0:ENC_SIZE]  # [4, 48]
    w1 = W[ROW_W1:ROW_W1 + ENC_SIZE, 0:H1]                             # [48, 64]
    w2 = W[ROW_W2:ROW_W2 + H1, 0:H2]                                   # [64, 32]
    w_hd = W[ROW_WHD:ROW_WHD + H2, :]                                  # [32, 128]
    b_enc = V[ROW_BENC:ROW_BENC + 1, 0:ENC_SIZE]
    b1 = V[ROW_B1:ROW_B1 + 1, 0:H1]
    b2 = V[ROW_B2:ROW_B2 + 1, 0:H2]
    ln_w = V[ROW_LNW:ROW_LNW + 1, 0:H2]
    ln_b = V[ROW_LNB:ROW_LNB + 1, 0:H2]
    b_hd = V[ROW_BHD:ROW_BHD + 1, :]

    # fused state/action feature extractors: block-diagonal weight split into
    # its state / action row blocks so no input concat is needed.
    h = (jnp.dot(s, w_s, preferred_element_type=jnp.float32)
         + jnp.dot(a, w_a, preferred_element_type=jnp.float32) + b_enc)
    h = jnp.maximum(h, 0.0)                               # [B, 48] f32

    # fc stack
    h = jnp.maximum(
        jnp.dot(h.astype(jnp.bfloat16), w1, preferred_element_type=jnp.float32) + b1, 0.0)
    h = jnp.maximum(
        jnp.dot(h.astype(jnp.bfloat16), w2, preferred_element_type=jnp.float32) + b2, 0.0)

    # LayerNorm (biased variance, as in torch), all f32
    mean = jnp.mean(h, axis=-1, keepdims=True)
    var = jnp.mean(jnp.square(h - mean), axis=-1, keepdims=True)
    h = (h - mean) * jax.lax.rsqrt(var + LN_EPS) * ln_w + ln_b

    # fused mu|sigma head -> single lane-dense, unmasked [B, 128] store
    raw = jnp.dot(h.astype(jnp.bfloat16), w_hd, preferred_element_type=jnp.float32) + b_hd
    sig = MIN_SIGMA + (MAX_SIGMA - MIN_SIGMA) * jax.nn.sigmoid(raw)
    lane = jax.lax.broadcasted_iota(jnp.int32, raw.shape, 1)
    out_ref[...] = jnp.where(lane >= SIGMA_COL, sig, raw).astype(out_ref.dtype)


# ------------------------------ wrapper --------------------------------------
@jax.jit
def state_transition_decoder_bisim(state, action, packed_w, packed_v):
    B = state.shape[0]
    flops = 2 * B * (AUG_STATE_SIZE * ENC_SIZE + ACTION_SIZE * ENC_SIZE
                     + ENC_SIZE * H1 + H1 * H2 + H2 * HEAD_PAD)
    bytes_accessed = (state.size * 4 + action.size * 4
                      + packed_w.size * 2 + packed_v.size * 4 + B * HEAD_PAD * 4)
    out = pl.pallas_call(
        _decoder_kernel,
        out_shape=jax.ShapeDtypeStruct((B, HEAD_PAD), jnp.float32),
        in_specs=[
            pl.BlockSpec(memory_space=pltpu.MemorySpace.VMEM),   # state
            pl.BlockSpec(memory_space=pltpu.MemorySpace.VMEM),   # action
            pl.BlockSpec(memory_space=pltpu.MemorySpace.VMEM),   # bf16 weights
            pl.BlockSpec(memory_space=pltpu.MemorySpace.VMEM),   # f32 vectors
        ],
        out_specs=pl.BlockSpec(memory_space=pltpu.MemorySpace.VMEM),
        cost_estimate=pl.CostEstimate(
            flops=flops,
            transcendentals=B * HEAD_PAD + B,
            bytes_accessed=bytes_accessed),
    )(state, action, packed_w, packed_v)
    # Consumers that can take lane offsets should use `out` directly; these
    # slices fuse into downstream ops otherwise.
    mu = out[:, :OUT_SIZE]
    sigma = out[:, SIGMA_COL:SIGMA_COL + OUT_SIZE]
    return mu, sigma


# ------------------------- parameter init / packing --------------------------
def _linear_init(key, fan_in, fan_out):
    # PyTorch nn.Linear default: U(-1/sqrt(fan_in), 1/sqrt(fan_in)); weights
    # stored pre-transposed as [in, out] so the kernel does plain x @ W.
    kw, kb = jax.random.split(key)
    bound = 1.0 / jnp.sqrt(jnp.float32(fan_in))
    w = jax.random.uniform(kw, (fan_in, fan_out), jnp.float32, -bound, bound)
    b = jax.random.uniform(kb, (fan_out,), jnp.float32, -bound, bound)
    return w, b


def make_params(key):
    keys = jax.random.split(key, 6)
    ws, bs = _linear_init(keys[0], AUG_STATE_SIZE, STATE_EMBED_SIZE)
    wa, ba = _linear_init(keys[1], ACTION_SIZE, ACTION_EMBED_SIZE)
    w1, b1 = _linear_init(keys[2], ENC_SIZE, H1)
    w2, b2 = _linear_init(keys[3], H1, H2)
    lnw = jnp.ones((H2,), jnp.float32)     # torch LayerNorm init
    lnb = jnp.zeros((H2,), jnp.float32)
    wmu, bmu = _linear_init(keys[4], H2, OUT_SIZE)
    wsg, bsg = _linear_init(keys[5], H2, OUT_SIZE)
    return (ws, bs, wa, ba, w1, b1, w2, b2, lnw, lnb, wmu, bmu, wsg, bsg)


def pack_params(params):
    (ws, bs, wa, ba, w1, b1, w2, b2, lnw, lnb, wmu, bmu, wsg, bsg) = params
    # bf16 weight buffer; block-diagonal fused encoder:
    # concat(relu(s@Ws+bs), relu(a@Wa+ba)) == relu(s@W[:16] + a@W[16:20] + b_enc)
    W = jnp.zeros((W_ROWS, HEAD_PAD), jnp.float32)
    W = W.at[ROW_WENC:ROW_WENC + AUG_STATE_SIZE, 0:STATE_EMBED_SIZE].set(ws)
    W = W.at[ROW_WENC + AUG_STATE_SIZE:ROW_WENC + IN_SIZE,
             STATE_EMBED_SIZE:ENC_SIZE].set(wa)
    W = W.at[ROW_W1:ROW_W1 + ENC_SIZE, 0:H1].set(w1)
    W = W.at[ROW_W2:ROW_W2 + H1, 0:H2].set(w2)
    # fused head: mu in lanes [0, OUT_SIZE), sigma in [SIGMA_COL, SIGMA_COL+OUT_SIZE)
    W = W.at[ROW_WHD:ROW_WHD + H2, 0:OUT_SIZE].set(wmu)
    W = W.at[ROW_WHD:ROW_WHD + H2, SIGMA_COL:SIGMA_COL + OUT_SIZE].set(wsg)
    W = W.astype(jnp.bfloat16)

    # f32 vector buffer (biases / LayerNorm / head bias)
    V = jnp.zeros((V_ROWS, HEAD_PAD), jnp.float32)
    V = V.at[ROW_BENC, 0:STATE_EMBED_SIZE].set(bs)
    V = V.at[ROW_BENC, STATE_EMBED_SIZE:ENC_SIZE].set(ba)
    V = V.at[ROW_B1, 0:H1].set(b1)
    V = V.at[ROW_B2, 0:H2].set(b2)
    V = V.at[ROW_LNW, 0:H2].set(lnw)
    V = V.at[ROW_LNB, 0:H2].set(lnb)
    V = V.at[ROW_BHD, 0:OUT_SIZE].set(bmu)
    V = V.at[ROW_BHD, SIGMA_COL:SIGMA_COL + OUT_SIZE].set(bsg)
    return W, V


# ------------------------- pure-JAX reference (for sanity) -------------------
def reference(state, action, params):
    (ws, bs, wa, ba, w1, b1, w2, b2, lnw, lnb, wmu, bmu, wsg, bsg) = params
    hs = jax.nn.relu(state @ ws + bs)
    ha = jax.nn.relu(action @ wa + ba)
    h = jnp.concatenate([hs, ha], axis=-1)
    h = jax.nn.relu(h @ w1 + b1)
    h = jax.nn.relu(h @ w2 + b2)
    mean = jnp.mean(h, -1, keepdims=True)
    var = jnp.mean(jnp.square(h - mean), -1, keepdims=True)
    h = (h - mean) / jnp.sqrt(var + LN_EPS) * lnw + lnb
    mu = h @ wmu + bmu
    sigma = MIN_SIGMA + (MAX_SIGMA - MIN_SIGMA) * jax.nn.sigmoid(h @ wsg + bsg)
    return mu, sigma


if __name__ == "__main__":
    key = jax.random.PRNGKey(0)
    kp, ks, ka = jax.random.split(key, 3)
    params = make_params(kp)
    packed_w, packed_v = pack_params(params)
    state = jax.random.normal(ks, (BATCH, AUG_STATE_SIZE), jnp.float32)
    action = jax.random.normal(ka, (BATCH, ACTION_SIZE), jnp.float32)

    mu, sigma = state_transition_decoder_bisim(state, action, packed_w, packed_v)
    jax.block_until_ready((mu, sigma))

    mu_ref, sigma_ref = reference(state, action, params)
    assert mu.shape == (BATCH, OUT_SIZE) and sigma.shape == (BATCH, OUT_SIZE)
    # Weights are packed in bf16 (per perf review); against the full-f32
    # reference the expected deviation is O(5e-3) for these ReLU/LN-bounded
    # magnitudes, so 3e-2 is a safe bound that still catches any packing bug.
    assert jnp.allclose(mu, mu_ref, atol=3e-2, rtol=3e-2)
    assert jnp.allclose(sigma, sigma_ref, atol=3e-2, rtol=3e-2)

    print("KERNEL_OK")
</pallas_src>

<mosaic_0001>
module attributes {stable_mosaic.version = 11 : i64} {
  func.func @_decoder_kernel(%arg0: memref<16x16xf32, #tpu.memory_space<vmem>>, %arg1: memref<16x4xf32, #tpu.memory_space<vmem>>, %arg2: memref<176x128xbf16, #tpu.memory_space<vmem>>, %arg3: memref<8x128xf32, #tpu.memory_space<vmem>>, %arg4: memref<16x128xf32, #tpu.memory_space<vmem>>) attributes {dimension_semantics = [], scalar_prefetch = 0 : i64, scratch_operands = 0 : i64, tpu.core_type = #tpu.core_type<tc>} {
    %c0 = arith.constant 0 : index
    %c0_0 = arith.constant 0 : index
    %0 = vector.load %arg0[%c0, %c0_0] : memref<16x16xf32, #tpu.memory_space<vmem>>, vector<16x16xf32>
    %1 = arith.truncf %0 : vector<16x16xf32> to vector<16x16xbf16>
    %c0_1 = arith.constant 0 : index
    %c0_2 = arith.constant 0 : index
    %2 = vector.load %arg1[%c0_1, %c0_2] : memref<16x4xf32, #tpu.memory_space<vmem>>, vector<16x4xf32>
    %3 = arith.truncf %2 : vector<16x4xf32> to vector<16x4xbf16>
    %c0_3 = arith.constant 0 : index
    %c0_4 = arith.constant 0 : index
    %4 = vector.load %arg2[%c0_3, %c0_4] : memref<176x128xbf16, #tpu.memory_space<vmem>>, vector<16x48xbf16>
    %c16 = arith.constant 16 : index
    %c0_5 = arith.constant 0 : index
    %5 = vector.load %arg2[%c16, %c0_5] : memref<176x128xbf16, #tpu.memory_space<vmem>>, vector<4x48xbf16>
    %c32 = arith.constant 32 : index
    %c0_6 = arith.constant 0 : index
    %6 = vector.load %arg2[%c32, %c0_6] : memref<176x128xbf16, #tpu.memory_space<vmem>>, vector<48x64xbf16>
    %c80 = arith.constant 80 : index
    %c0_7 = arith.constant 0 : index
    %7 = vector.load %arg2[%c80, %c0_7] : memref<176x128xbf16, #tpu.memory_space<vmem>>, vector<64x32xbf16>
    %c144 = arith.constant 144 : index
    %c0_8 = arith.constant 0 : index
    %8 = vector.load %arg2[%c144, %c0_8] : memref<176x128xbf16, #tpu.memory_space<vmem>>, vector<32x128xbf16>
    %c0_9 = arith.constant 0 : index
    %c0_10 = arith.constant 0 : index
    %9 = vector.load %arg3[%c0_9, %c0_10] : memref<8x128xf32, #tpu.memory_space<vmem>>, vector<1x48xf32>
    %c1 = arith.constant 1 : index
    %c0_11 = arith.constant 0 : index
    %10 = vector.load %arg3[%c1, %c0_11] : memref<8x128xf32, #tpu.memory_space<vmem>>, vector<1x64xf32>
    %c2 = arith.constant 2 : index
    %c0_12 = arith.constant 0 : index
    %11 = vector.load %arg3[%c2, %c0_12] : memref<8x128xf32, #tpu.memory_space<vmem>>, vector<1x32xf32>
    %c3 = arith.constant 3 : index
    %c0_13 = arith.constant 0 : index
    %12 = vector.load %arg3[%c3, %c0_13] : memref<8x128xf32, #tpu.memory_space<vmem>>, vector<1x32xf32>
    %c4 = arith.constant 4 : index
    %c0_14 = arith.constant 0 : index
    %13 = vector.load %arg3[%c4, %c0_14] : memref<8x128xf32, #tpu.memory_space<vmem>>, vector<1x32xf32>
    %c5 = arith.constant 5 : index
    %c0_15 = arith.constant 0 : index
    %14 = vector.load %arg3[%c5, %c0_15] : memref<8x128xf32, #tpu.memory_space<vmem>>, vector<1x128xf32>
    %cst = arith.constant dense<0.000000e+00> : vector<16x48xf32>
    %15 = tpu.matmul %1, %4, %cst {dimension_numbers = #tpu.dot_dimension_numbers<[1], [0], [0], [1], [0, 0, 1, 1], [], []>} : vector<16x16xbf16>, vector<16x48xbf16>, vector<16x48xf32> -> vector<16x48xf32>
    %cst_16 = arith.constant dense<0.000000e+00> : vector<16x48xf32>
    %16 = tpu.matmul %3, %5, %cst_16 {dimension_numbers = #tpu.dot_dimension_numbers<[1], [0], [0], [1], [0, 0, 1, 1], [], []>} : vector<16x4xbf16>, vector<4x48xbf16>, vector<16x48xf32> -> vector<16x48xf32>
    %17 = arith.addf %15, %16 : vector<16x48xf32>
    %18 = vector.broadcast %9 : vector<1x48xf32> to vector<16x48xf32>
    %19 = arith.addf %17, %18 : vector<16x48xf32>
    %cst_17 = arith.constant 0.000000e+00 : f32
    %20 = vector.broadcast %cst_17 : f32 to vector<16x48xf32>
    %21 = arith.maximumf %19, %20 : vector<16x48xf32>
    %22 = arith.truncf %21 : vector<16x48xf32> to vector<16x48xbf16>
    %cst_18 = arith.constant dense<0.000000e+00> : vector<16x64xf32>
    %23 = tpu.matmul %22, %6, %cst_18 {dimension_numbers = #tpu.dot_dimension_numbers<[1], [0], [0], [1], [0, 0, 1, 1], [], []>} : vector<16x48xbf16>, vector<48x64xbf16>, vector<16x64xf32> -> vector<16x64xf32>
    %24 = vector.broadcast %10 : vector<1x64xf32> to vector<16x64xf32>
    %25 = arith.addf %23, %24 : vector<16x64xf32>
    %cst_19 = arith.constant 0.000000e+00 : f32
    %26 = vector.broadcast %cst_19 : f32 to vector<16x64xf32>
    %27 = arith.maximumf %25, %26 : vector<16x64xf32>
    %28 = arith.truncf %27 : vector<16x64xf32> to vector<16x64xbf16>
    %cst_20 = arith.constant dense<0.000000e+00> : vector<16x32xf32>
    %29 = tpu.matmul %28, %7, %cst_20 {dimension_numbers = #tpu.dot_dimension_numbers<[1], [0], [0], [1], [0, 0, 1, 1], [], []>} : vector<16x64xbf16>, vector<64x32xbf16>, vector<16x32xf32> -> vector<16x32xf32>
    %30 = vector.broadcast %11 : vector<1x32xf32> to vector<16x32xf32>
    %31 = arith.addf %29, %30 : vector<16x32xf32>
    %cst_21 = arith.constant 0.000000e+00 : f32
    %32 = vector.broadcast %cst_21 : f32 to vector<16x32xf32>
    %33 = arith.maximumf %31, %32 : vector<16x32xf32>
    %cst_22 = arith.constant dense<0.000000e+00> : vector<16xf32>
    %34 = vector.multi_reduction <add>, %33, %cst_22 [1] : vector<16x32xf32> to vector<16xf32>
    %35 = vector.shape_cast %34 : vector<16xf32> to vector<16x1xf32>
    %cst_23 = arith.constant 3.200000e+01 : f32
    %36 = vector.broadcast %cst_23 : f32 to vector<16x1xf32>
    %37 = arith.divf %35, %36 : vector<16x1xf32>
    %38 = vector.broadcast %37 : vector<16x1xf32> to vector<16x32xf32>
    %39 = arith.subf %33, %38 : vector<16x32xf32>
    %40 = arith.mulf %39, %39 : vector<16x32xf32>
    %cst_24 = arith.constant dense<0.000000e+00> : vector<16xf32>
    %41 = vector.multi_reduction <add>, %40, %cst_24 [1] : vector<16x32xf32> to vector<16xf32>
    %42 = vector.shape_cast %41 : vector<16xf32> to vector<16x1xf32>
    %cst_25 = arith.constant 3.200000e+01 : f32
    %43 = vector.broadcast %cst_25 : f32 to vector<16x1xf32>
    %44 = arith.divf %42, %43 : vector<16x1xf32>
    %45 = vector.broadcast %37 : vector<16x1xf32> to vector<16x32xf32>
    %46 = arith.subf %33, %45 : vector<16x32xf32>
    %cst_26 = arith.constant 9.99999974E-6 : f32
    %47 = vector.broadcast %cst_26 : f32 to vector<16x1xf32>
    %48 = arith.addf %44, %47 : vector<16x1xf32>
    %49 = math.rsqrt %48 : vector<16x1xf32>
    %50 = vector.broadcast %49 : vector<16x1xf32> to vector<16x32xf32>
    %51 = arith.mulf %46, %50 : vector<16x32xf32>
    %52 = vector.broadcast %12 : vector<1x32xf32> to vector<16x32xf32>
    %53 = arith.mulf %51, %52 : vector<16x32xf32>
    %54 = vector.broadcast %13 : vector<1x32xf32> to vector<16x32xf32>
    %55 = arith.addf %53, %54 : vector<16x32xf32>
    %56 = arith.truncf %55 : vector<16x32xf32> to vector<16x32xbf16>
    %cst_27 = arith.constant dense<0.000000e+00> : vector<16x128xf32>
    %57 = tpu.matmul %56, %8, %cst_27 {dimension_numbers = #tpu.dot_dimension_numbers<[1], [0], [0], [1], [0, 0, 1, 1], [], []>} : vector<16x32xbf16>, vector<32x128xbf16>, vector<16x128xf32> -> vector<16x128xf32>
    %58 = vector.broadcast %14 : vector<1x128xf32> to vector<16x128xf32>
    %59 = arith.addf %57, %58 : vector<16x128xf32>
    %60 = arith.negf %59 : vector<16x128xf32>
    %61 = math.exp %60 : vector<16x128xf32>
    %cst_28 = arith.constant 1.000000e+00 : f32
    %62 = vector.broadcast %cst_28 : f32 to vector<16x128xf32>
    %63 = arith.addf %62, %61 : vector<16x128xf32>
    %64 = arith.divf %62, %63 : vector<16x128xf32>
    %cst_29 = arith.constant 9.99989986 : f32
    %65 = vector.broadcast %cst_29 : f32 to vector<16x128xf32>
    %66 = arith.mulf %65, %64 : vector<16x128xf32>
    %cst_30 = arith.constant 9.99999974E-5 : f32
    %67 = vector.broadcast %cst_30 : f32 to vector<16x128xf32>
    %68 = arith.addf %67, %66 : vector<16x128xf32>
    %69 = tpu.iota {dimensions = array<i32: 1>} : vector<16x128xi32>
    %c64_i32 = arith.constant 64 : i32
    %70 = vector.broadcast %c64_i32 : i32 to vector<16x128xi32>
    %71 = arith.cmpi sge, %69, %70 : vector<16x128xi32>
    %72 = arith.select %71, %68, %59 : vector<16x128xi1>, vector<16x128xf32>
    %c0_31 = arith.constant 0 : index
    %c0_32 = arith.constant 0 : index
    %73 = vector.load %arg4[%c0_31, %c0_32] : memref<16x128xf32, #tpu.memory_space<vmem>>, vector<16x128xf32>
    tpu.vector_store %arg4[%c0_31, %c0_32], %72 {strides = array<i32>} : memref<16x128xf32, #tpu.memory_space<vmem>>, vector<16x128xf32>,
    return
  }
}

</mosaic_0001>

<bundles_post_ra>
// kernel: state_transition_decoder_bisim.1
= control target key start
LH: loop header
LB: loop body
LE: loop exit
PB: predicated region body
PF: predicated region fallthrough
CT: control target
= control target key end

     0   :  { %9 = vsyncpa [#allocation3], 0  ;;  %s580_s15 = smov [#allocation2]   ;;  %s684_s0 = inlined_call_operand.vmem [shape: f32[16,16], index: 0, kind: input, shape index: {}]   ;;  %s685_s1 = inlined_call_operand.vmem [shape: f32[16,4], index: 1, kind: input, shape index: {}]   ;;  %s686_s2 = inlined_call_operand.hbm [shape: bf16[176,128], index: 2, kind: input, shape index: {}]   ;;  %s687_s3 = inlined_call_operand.vmem [shape: f32[8,128], index: 3, kind: input, shape index: {}]   ;;  %s688_s4 = inlined_call_operand.vmem [shape: f32[16,128], index: 4, kind: output, shape index: {}]  }
   0x1   :  { %s19_s16 = sshll.u32 %s580_s15, 4  ;;  %s556_s19 = scalar_lea.hbm %s686_s2, 1408  ;;  %s20_s16 = int_to_ptr.vmem [resolvable:$true] %s19_s16 }
   0x2   :  { %p557_p0 = scmp.ne.s32.totalorder %s686_s2, %s556_s19  ;;  %p560_p1 = scmp.lt.u32.totalorder %s556_s19, %s686_s2 }
   0x4   :  { %p562_p2 = pnand %p560_p1, %p557_p0 }
   0x6   :  { %565 = shalt.err (!%p562_p2)
}
   0x7   :  { %s566_s24 = scalar_lea.vmem %s20_s16, 1408  ;;  %p571_p4 = scmp.lt.s32.totalorder %s20_s16, %s20_s16 }
   0x8   :  { %p567_p3 = scmp.ne.s32.totalorder %s20_s16, %s566_s24  ;;  %p572_p5 = scmp.lt.s32.totalorder %s566_s24, %s566_s24 }
   0xa   :  { %p573_p6 = por %p572_p5, %p571_p4 }
   0xc   :  { %p574_p7 = pnand %p573_p6, %p567_p3 }
   0xe   :  { %577 = shalt.err (!%p574_p7)
}
   0xf   :  { %s581_s25 = smov 64   ;;  %s582_s26 = smov 4  }
  0x10   :  { %25 = dma.hbm_to_vmem [thread:$0]  %s686_s2, 1408, %s20_s16, [#allocation3], %s581_s25, %s581_s25, %s582_s26  }
  0x11   :  { %578 = dma.done.wait [#allocation3], 1408  }
  0x12   :  { %579 = vsyncadd [#allocation3], 4294965888  ;;  %v583_v0 = vmov 0.0   ;;  %vm584_vm0 = vmmov 0   ;;  %vm69_vm1 = vcmask 1041408   ;;  %v534_v3 = vld [vmem:[#allocation2] sm:$0xff]  }
  0x13   :  { %487 = vmatprep.subr.bf16.mxu0 %v583_v0  ;;  %493 = vmatprep.subr.bf16.mxu1 %v583_v0  ;;  %v40_v1 = vld [vmem:[#allocation2 + $0x8] sm:$0x3]  ;;  %v35_v4 = vld [vmem:[%s685_s1] sm:$0xff]  ;;  %vm65_vm2 = vcmask 31744   ;;  %vm120_vm3 = vcmask 130048   ;;  %v535_v10 = vld [vmem:[#allocation2 + $0x10] sm:$0xff]  }
  0x14   :  { %489 = vmatprep.mubr.msk.bf16.mxu0 %vm584_vm0, %v583_v0  ;;  %495 = vmatprep.mubr.msk.bf16.mxu1 %vm584_vm0, %v583_v0  ;;  %v71_v2 = vsel %vm69_vm1, %v40_v1, 0  ;;  %v36_v5 = vld [vmem:[%s685_s1 + $0x8] sm:$0xff]  ;;  %v32_v7 = vld [vmem:[%s684_s0] sm:$0xff]  ;;  %v536_v11 = vld [vmem:[#allocation2 + $0x18] sm:$0xff]   ;;  %vm196_vm4 = vcmask 392192   ;;  %vm272_vm5 = vcmask 523264  }
  0x15   :  { %488 = vmatpush3.bf16.msra.mxu0 %v71_v2  ;;  %v37_v6 = vpack.c.bf16 %v36_v5, %v35_v4  ;;  %v33_v8 = vld [vmem:[%s684_s0 + $0x8] sm:$0xff]  ;;  %494 = vmatpush3.bf16.msra.mxu1 %v534_v3  ;;  %v537_v12 = vld [vmem:[#allocation2 + $0x20] sm:$0xff]   ;;  %v539_v14 = vld [vmem:[#allocation2 + $0x30] sm:$0xff]   ;;  %vm319_vm6 = vcmask 261120  }
  0x16   :  { %v34_v9 = vpack.c.bf16 %v33_v8, %v32_v7  ;;  %499 = vmatprep.subr.bf16.mxu0 %v583_v0  ;;  %509 = vmatprep.subr.bf16.mxu1 %v583_v0  ;;  %v538_v13 = vld [vmem:[#allocation2 + $0x28] sm:$0xff]   ;;  %v451_v17 = vld [vmem:[%s687_s3] ss:$0 sm:$0xff]  ;;  %v540_v31 = vld [vmem:[#allocation2 + $0x38] sm:$0xff]  }
  0x17   :  { %v541_v32 = vld [vmem:[#allocation2 + $0x40] sm:$0xff]   ;;  %v542_v1 = vld [vmem:[#allocation2 + $0x48] sm:$0xff]   ;;  %v543_v2 = vld [vmem:[#allocation2 + $0x50] sm:$0xff]  }
  0x18   :  { %490 = vmatmul.mubr.msk.bf16.vlgmr.msra.gmra.mrb[0].mxu0 %vm65_vm2, %v37_v6  ;;  %496 = vmatmul.mubr.msk.bf16.vlgmr.msra.gmra.mrb[0].mxu1 %vm120_vm3, %v34_v9  ;;  %v452_v33 = vld [vmem:[%s687_s3 + $0x1] ss:$0 sm:$0xff]  ;;  %v457_v43 = vld [vmem:[%s687_s3 + $0x2] ss:$0 sm:$0xff] }
  0x19   :  { %505 = vmatprep.mubr.msk.bf16.mxu0 %vm584_vm0, %v583_v0  ;;  %517 = vmatprep.mubr.msk.bf16.mxu1 %vm584_vm0, %v583_v0 }
  0x1a   :  { %500 = vmatpush3.bf16.msra.mxu0 %v535_v10  ;;  %510 = vmatpush3.bf16.msra.mxu1 %v538_v13 }
  0x1b   :  { %501 = vmatprep.subr.bf16.mxu0 %v583_v0  ;;  %511 = vmatprep.subr.bf16.mxu1 %v583_v0 }
  0x1e   :  { %502 = vmatpush3.bf16.msra.mxu0 %v536_v11  ;;  %512 = vmatpush3.bf16.msra.mxu1 %v539_v14  ;;  %v463_v11 = vld [vmem:[%s687_s3 + $0x3] ss:$0 sm:$0xff] }
  0x1f   :  { %503 = vmatprep.subr.bf16.mxu0 %v583_v0  ;;  %513 = vmatprep.subr.bf16.mxu1 %v583_v0 }
  0x22   :  { %504 = vmatpush3.bf16.msra.mxu0 %v537_v12  ;;  %514 = vmatpush3.bf16.msra.mxu1 %v540_v31 }
  0x23   :  { %521 = vmatprep.subr.bf16.mxu0 %v583_v0  ;;  %515 = vmatprep.subr.bf16.mxu1 %v583_v0 }
  0x26   :  { %516 = vmatpush3.bf16.msra.mxu1 %v541_v32  ;;  %v436_v32 = vlaneseq }
  0xeb   :  { %v107_v15 = vpop.f32.mrb[0].mxu0  ;;  %v158_v18 = vpop.f32.mrb[0].mxu1 }
  0xec   :  { %v491_v16 = vpop.f32.mrb[1].mxu0  ;;  %v159_v19 = vadd.f32 %v158_v18, %v107_v15  ;;  %v497_v21 = vpop.f32.mrb[1].mxu1 }
  0xed   :  { %v110_v20 = vpop.f32.mrb[2].mxu0  ;;  %v161_v23 = vpop.f32.mrb[2].mxu1 }
  0xee   :  { %v492_v22 = vpop.f32.mrb[3].mxu0  ;;  %v169_v24 = vadd.f32 %v451_v17, %v159_v19  ;;  %v162_v25 = vadd.f32 %v161_v23, %v110_v20  ;;  %v498_v26 = vpop.f32.mrb[3].mxu1  ;;  %v465_v19 = vld [vmem:[%s687_s3 + $0x5] ss:$0 sm:$0xff] }
  0xf0   :  { %v170_v27 = vadd.f32 %v451_v17, %v162_v25  ;;  %v171_v28 = vmax.f32 %v169_v24, 0.0 }
  0xf2   :  { %v172_v29 = vmax.f32 %v170_v27, 0.0 }
  0xf4   :  { %v173_v30 = vpack.c.bf16 %v172_v29, %v171_v28 }
  0xf6   :  { %506 = vmatmul.mubr.msk.bf16.vlgmr.msra.gmra.mrb[4].mxu0 %vm196_vm4, %v173_v30 }
  0xf7   :  { %525 = vmatprep.mubr.msk.bf16.mxu0 %vm584_vm0, %v583_v0  ;;  %522 = vmatpush3.bf16.msra.mxu0 %v542_v1 }
  0xf8   :  { %523 = vmatprep.subr.bf16.mxu0 %v583_v0  ;;  %v464_v0 = vld [vmem:[%s687_s3 + $0x4] ss:$0 sm:$0xff] }
  0xfb   :  { %524 = vmatpush3.bf16.msra.mxu0 %v543_v2 }
 0x1c9   :  { %v234_v34 = vpop.f32.mrb[4].mxu0 }
 0x1ca   :  { %v235_v35 = vadd.f32 %v452_v33, %v234_v34  ;;  %v507_v36 = vpop.f32.mrb[5].mxu0 }
 0x1cb   :  { %v237_v37 = vpop.f32.mrb[6].mxu0 }
 0x1cc   :  { %v238_v38 = vadd.f32 %v452_v33, %v237_v37  ;;  %v508_v39 = vpop.f32.mrb[7].mxu0  ;;  %v241_v40 = vmax.f32 %v235_v35, 0.0  ;;  %v437_v33 = vand.u32 127, %v436_v32 }
 0x1ce   :  { %v242_v41 = vmax.f32 %v238_v38, 0.0  ;;  %vm438_vm7 = vcmp.ge.s32.totalorder %v437_v33, 64 }
 0x1d0   :  { %v243_v42 = vpack.c.bf16 %v242_v41, %v241_v40 }
 0x1d2   :  { %518 = vmatmul.mubr.msk.bf16.vlgmr.msra.gmra.mrb[4].mxu1 %vm272_vm5, %v243_v42 }
 0x2a5   :  { %v310_v44 = vpop.f32.mrb[4].mxu1 }
 0x2a6   :  { %v311_v45 = vadd.f32 %v457_v43, %v310_v44  ;;  %v519_v46 = vpop.f32.mrb[5].mxu1 }
 0x2a7   :  { %v313_v47 = vpop.f32.mrb[6].mxu1 }
 0x2a8   :  { %v317_v48 = vmax.f32 %v311_v45, 0.0  ;;  %v314_v49 = vadd.f32 %v457_v43, %v313_v47  ;;  %v520_v50 = vpop.f32.mrb[7].mxu1 }
 0x2aa   :  { %v318_v51 = vmax.f32 %v314_v49, 0.0  ;;  %v320_v52 = vsel %vm319_vm6, %v317_v48, 0.0 }
 0x2ab   :  { %321 = vadd.xlane.f32.xlu0 %v320_v52 }
 0x2ac   :  { %v323_v53 = vsel %vm319_vm6, %v318_v51, 0.0 }
 0x2af   :  { %324 = vadd.xlane.f32.xlu0 %v323_v53 }
 0x338   :  { %v322_v54 = vpop.xlane.xlu0 %321 }
 0x339   :  { %v327_v55 = vmul.f32 0.03125, %v322_v54 }
 0x33b   :  { %v329_v56 = vsub.f32 %v317_v48, %v327_v55 }
 0x33c   :  { %v325_v57 = vpop.xlane.xlu0 %324 }
 0x33d   :  { %v328_v58 = vmul.f32 0.03125, %v325_v57  ;;  %v331_v59 = vmul.f32 %v329_v56, %v329_v56 }
 0x33f   :  { %v330_v60 = vsub.f32 %v318_v51, %v328_v58  ;;  %v333_v61 = vsel %vm319_vm6, %v331_v59, 0.0 }
 0x340   :  { %334 = vadd.xlane.f32.xlu1 %v333_v61 }
 0x341   :  { %v332_v62 = vmul.f32 %v330_v60, %v330_v60 }
 0x343   :  { %v336_v63 = vsel %vm319_vm6, %v332_v62, 0.0 }
 0x344   :  { %337 = vadd.xlane.f32.xlu1 %v336_v63 }
 0x3cd   :  { %v335_v3 = vpop.xlane.xlu1 %334 }
 0x3ce   :  { %v339_v4 = vmul.f32 0.03125, %v335_v3 }
 0x3d0   :  { %v341_v5 = vadd.f32 1e-05, %v339_v4 }
 0x3d1   :  { %v338_v6 = vpop.xlane.xlu1 %337 }
 0x3d2   :  { %544 = vrsqrt.f32 %v341_v5  ;;  %v340_v7 = vmul.f32 0.03125, %v338_v6 }
 0x3d4   :  { %v342_v8 = vadd.f32 1e-05, %v340_v7 }
 0x3d6   :  { %546 = vrsqrt.f32 %v342_v8 }
 0x3dc   :  { %v545_v9 = vpop.eup %544 }
 0x3dd   :  { %v345_v10 = vmul.f32 %v545_v9, %v329_v56 }
 0x3df   :  { %v351_v13 = vmul.f32 %v463_v11, %v345_v10 }
 0x3e0   :  { %v547_v12 = vpop.eup %546 }
 0x3e1   :  { %v346_v14 = vmul.f32 %v547_v12, %v330_v60  ;;  %v357_v16 = vadd.f32 %v464_v0, %v351_v13 }
 0x3e3   :  { %v352_v15 = vmul.f32 %v463_v11, %v346_v14 }
 0x3e5   :  { %v358_v17 = vadd.f32 %v464_v0, %v352_v15 }
 0x3e7   :  { %v359_v18 = vpack.c.bf16 %v358_v17, %v357_v16 }
 0x3e9   :  { %526 = vmatmul.mubr.msk.bf16.vlgmr.msra.gmra.mrb[8].mxu0 %vm319_vm6, %v359_v18 }
 0x4bc   :  { %v413_v20 = vpop.f32.mrb[8].mxu0 }
 0x4bd   :  { %v414_v21 = vadd.f32 %v465_v19, %v413_v20  ;;  %v527_v22 = vpop.f32.mrb[9].mxu0 }
 0x4be   :  { %v416_v23 = vpop.f32.mrb[10].mxu0 }
 0x4bf   :  { %v469_v24 = vmul.f32 -1.442695, %v414_v21  ;;  %v417_v25 = vadd.f32 %v465_v19, %v416_v23  ;;  %v528_v26 = vpop.f32.mrb[11].mxu0 }
 0x4c1   :  { %548 = vpow2.f32 %v469_v24  ;;  %v470_v27 = vmul.f32 -1.442695, %v417_v25 }
 0x4c3   :  { %550 = vpow2.f32 %v470_v27 }
 0x4cb   :  { %v549_v28 = vpop.eup %548 }
 0x4cc   :  { %v426_v29 = vadd.f32 1.0, %v549_v28 }
 0x4cd   :  { %v551_v30 = vpop.eup %550 }
 0x4ce   :  { %552 = vrcp.f32 %v426_v29  ;;  %v427_v31 = vadd.f32 1.0, %v551_v30 }
 0x4d0   :  { %554 = vrcp.f32 %v427_v31 }
 0x4d8   :  { %v553_v34 = vpop.eup %552 }
 0x4d9   :  { %v432_v35 = vmul.f32 9.9999, %v553_v34 }
 0x4da   :  { %v555_v36 = vpop.eup %554 }
 0x4db   :  { %v434_v37 = vadd.f32 0.0001, %v432_v35  ;;  %v433_v38 = vmul.f32 9.9999, %v555_v36 }
 0x4dd   :  { %v439_v39 = vsel %vm438_vm7, %v434_v37, %v414_v21  ;;  %v435_v40 = vadd.f32 0.0001, %v433_v38 }
 0x4de   :  { %441 = vst [vmem:[%s688_s4] sm:$0xff] %v439_v39 }
 0x4df   :  { %v440_v41 = vsel %vm438_vm7, %v435_v40, %v417_v25 }
 0x4e0   :  { %442 = vst [vmem:[%s688_s4 + $0x8] sm:$0xff] %v440_v41 }
 0x4e1   :  { %447 = vsyncpa [#allocation3], 1 }

</bundles_post_ra>
